<compile_context>
chip_gen: v6e
topology: v6e:2x2x1
jax: 0.10.0
libtpu: 0.0.40
codegen_flags: <defaults>
</compile_context>

<pallas_src>
import jax
import jax.numpy as jnp
from jax import lax
from jax.experimental import pallas as pl
from jax.experimental.pallas import tpu as pltpu  # noqa: F401  (TPU backend)


def lstm_decoder_kernel(x_ref, h0_ref, c0_ref, w_ih_ref, w_hh_ref, b_ref,
                        w_fc_ref, b_fc_ref,
                        out_ref, hn_ref, cn_ref):
    TBp, I = x_ref.shape
    Bp, H = h0_ref.shape
    T = TBp // Bp

    # ---- hoisted input projection: one matmul covering every timestep; the
    # result (T*Bp, 4H) is only ~T vregs and stays register-resident. --------
    xg = jnp.dot(x_ref[...], w_ih_ref[...],
                 preferred_element_type=jnp.float32) + b_ref[...]

    w_hh = w_hh_ref[...]                                   # loop-invariant vregs

    # Hoisted lane mask: lanes [2H, 3H) are the g (tanh) gate, rest sigmoid.
    lane = lax.broadcasted_iota(jnp.int32, (Bp, 4 * H), dimension=1)
    g_mask = (lane >= 2 * H) & (lane < 3 * H)

    h = h0_ref[...]
    c = c0_ref[...]
    hs = []
    # Python-unrolled sequential recurrence; h/c and every h_t stay in vregs.
    for t in range(T):
        gates = xg[t * Bp:(t + 1) * Bp, :] + jnp.dot(
            h, w_hh, preferred_element_type=jnp.float32)   # (Bp, 4H)
        # Full-vreg nonlinearities: sigmoid via tanh (exactly 1 EUP push each).
        sig = 0.5 * jnp.tanh(0.5 * gates) + 0.5
        tnh = jnp.tanh(gates)
        act = jnp.where(g_mask, tnh, sig)
        i_g = act[:, 0 * H:1 * H]
        f_g = act[:, 1 * H:2 * H]
        g_g = act[:, 2 * H:3 * H]
        o_g = act[:, 3 * H:4 * H]
        c = f_g * c + i_g * g_g
        h = o_g * jnp.tanh(c)
        hs.append(h)

    hn_ref[...] = h.astype(hn_ref.dtype)
    cn_ref[...] = c.astype(cn_ref.dtype)

    # ---- hoisted decoder head: relu(Linear(h)) * -1, one matmul, one 2-D
    # store (no per-step narrow stores, no VMEM staging of h_t). -------------
    h_all = jnp.concatenate(hs, axis=0)                    # (T*Bp, H), in vregs
    y = jnp.dot(h_all, w_fc_ref[...],
                preferred_element_type=jnp.float32) + b_fc_ref[...]
    out_ref[...] = (-jnp.maximum(y, 0.0)).astype(out_ref.dtype)


def lstm_decoder_forward(x_input, encoder_hidden_states, params):
    """x_input: (B, T, I) f32. encoder_hidden_states: (h0, c0), each (1, B, H)."""
    B, T, I = x_input.shape
    h0, c0 = encoder_hidden_states
    H = h0.shape[-1]
    w_ih, w_hh, b_ih, b_hh, w_fc, b_fc = (params["w_ih"], params["w_hh"],
                                          params["b_ih"], params["b_hh"],
                                          params["w_fc"], params["b_fc"])
    O = w_fc.shape[0]

    # Pad batch to the sublane size (multiple of 8) so vreg rows / MXU rows
    # are full; padding rows are computed but sliced away afterwards.
    Bp = max(8, ((B + 7) // 8) * 8)
    pad = Bp - B

    x_tm = jnp.transpose(x_input, (1, 0, 2))               # (T, B, I)
    if pad:
        x_tm = jnp.pad(x_tm, ((0, 0), (0, pad), (0, 0)))
        h0_2d = jnp.pad(h0[0], ((0, pad), (0, 0)))
        c0_2d = jnp.pad(c0[0], ((0, pad), (0, 0)))
    else:
        h0_2d, c0_2d = h0[0], c0[0]
    x_2d = x_tm.reshape(T * Bp, I)                         # layout plumbing in XLA

    w_ih_t = w_ih.T                                        # (I, 4H)
    w_hh_t = w_hh.T                                        # (H, 4H)
    b_comb = (b_ih + b_hh).reshape(1, 4 * H)               # (1, 4H)
    w_fc_t = w_fc.T                                        # (H, O)
    b_fc_2d = b_fc.reshape(1, O)                           # (1, O)

    out2d, h_n, c_n = pl.pallas_call(
        lstm_decoder_kernel,
        out_shape=(
            jax.ShapeDtypeStruct((T * Bp, O), jnp.float32),   # decoder output (2-D)
            jax.ShapeDtypeStruct((Bp, H), jnp.float32),       # h_n
            jax.ShapeDtypeStruct((Bp, H), jnp.float32),       # c_n
        ),
        # No grid: the whole problem (< 50 KiB) lives in VMEM for one call.
    )(x_2d, h0_2d, c0_2d, w_ih_t, w_hh_t, b_comb, w_fc_t, b_fc_2d)

    out = out2d.reshape(T, Bp, O)[:, :B, :]                # strip batch padding
    output = jnp.transpose(out, (1, 0, 2))                 # (B, T, O)
    return output, (h_n[:B][None], c_n[:B][None])


def lstm_decoder_reference(x_input, encoder_hidden_states, params):
    """Pure-JAX reference matching PyTorch nn.LSTM + Linear + relu * -1."""
    h0, c0 = encoder_hidden_states
    H = h0.shape[-1]
    w_ih, w_hh, b_ih, b_hh, w_fc, b_fc = (params["w_ih"], params["w_hh"],
                                          params["b_ih"], params["b_hh"],
                                          params["w_fc"], params["b_fc"])

    def step(carry, x_t):
        h, c = carry
        gates = x_t @ w_ih.T + b_ih + h @ w_hh.T + b_hh
        i = jax.nn.sigmoid(gates[:, 0 * H:1 * H])
        f = jax.nn.sigmoid(gates[:, 1 * H:2 * H])
        g = jnp.tanh(gates[:, 2 * H:3 * H])
        o = jax.nn.sigmoid(gates[:, 3 * H:4 * H])
        c = f * c + i * g
        h = o * jnp.tanh(c)
        return (h, c), h

    x_tm = jnp.transpose(x_input, (1, 0, 2))
    (h_n, c_n), hs = lax.scan(step, (h0[0], c0[0]), x_tm)
    lstm_out = jnp.transpose(hs, (1, 0, 2))                # (B, T, H)
    out = -jnp.maximum(lstm_out @ w_fc.T + b_fc, 0.0)
    return out, (h_n[None], c_n[None])


def init_params(key, input_size, hidden_size, output_size):
    """Deterministic init mimicking PyTorch uniform(-1/sqrt(H), 1/sqrt(H))."""
    ks = jax.random.split(key, 6)
    k_lstm = 1.0 / jnp.sqrt(hidden_size)
    k_fc = 1.0 / jnp.sqrt(hidden_size)
    u = lambda k, shape, s: jax.random.uniform(k, shape, jnp.float32, -s, s)
    return {
        "w_ih": u(ks[0], (4 * hidden_size, input_size), k_lstm),
        "w_hh": u(ks[1], (4 * hidden_size, hidden_size), k_lstm),
        "b_ih": u(ks[2], (4 * hidden_size,), k_lstm),
        "b_hh": u(ks[3], (4 * hidden_size,), k_lstm),
        "w_fc": u(ks[4], (output_size, hidden_size), k_fc),
        "b_fc": u(ks[5], (output_size,), k_fc),
    }


if __name__ == "__main__":
    B, T = 2, 8
    input_size, hidden_size, output_size = 8, 32, 8

    key = jax.random.PRNGKey(0)
    k_x, k_h, k_c, k_p = jax.random.split(key, 4)

    x = jax.random.normal(k_x, (B, T, input_size), jnp.float32)
    h0 = jax.random.normal(k_h, (1, B, hidden_size), jnp.float32)
    c0 = jax.random.normal(k_c, (1, B, hidden_size), jnp.float32)
    params = init_params(k_p, input_size, hidden_size, output_size)

    out, (h_n, c_n) = lstm_decoder_forward(x, (h0, c0), params)
    jax.block_until_ready((out, h_n, c_n))

    ref_out, (ref_h, ref_c) = lstm_decoder_reference(x, (h0, c0), params)
    assert jnp.allclose(out, ref_out, atol=1e-5, rtol=1e-5)
    assert jnp.allclose(h_n, ref_h, atol=1e-5, rtol=1e-5)
    assert jnp.allclose(c_n, ref_c, atol=1e-5, rtol=1e-5)

    print("KERNEL_OK")
</pallas_src>

<mosaic_0001>
module attributes {stable_mosaic.version = 11 : i64} {
  func.func @lstm_decoder_kernel(%arg0: memref<64x8xf32, #tpu.memory_space<vmem>>, %arg1: memref<8x32xf32, #tpu.memory_space<vmem>>, %arg2: memref<8x32xf32, #tpu.memory_space<vmem>>, %arg3: memref<8x128xf32, #tpu.memory_space<vmem>>, %arg4: memref<32x128xf32, #tpu.memory_space<vmem>>, %arg5: memref<1x128xf32, #tpu.memory_space<vmem>>, %arg6: memref<32x8xf32, #tpu.memory_space<vmem>>, %arg7: memref<1x8xf32, #tpu.memory_space<vmem>>, %arg8: memref<64x8xf32, #tpu.memory_space<vmem>>, %arg9: memref<8x32xf32, #tpu.memory_space<vmem>>, %arg10: memref<8x32xf32, #tpu.memory_space<vmem>>) attributes {dimension_semantics = [], scalar_prefetch = 0 : i64, scratch_operands = 0 : i64, tpu.core_type = #tpu.core_type<tc>} {
    %c0 = arith.constant 0 : index
    %c0_0 = arith.constant 0 : index
    %0 = vector.load %arg0[%c0, %c0_0] : memref<64x8xf32, #tpu.memory_space<vmem>>, vector<64x8xf32>
    %c0_1 = arith.constant 0 : index
    %c0_2 = arith.constant 0 : index
    %1 = vector.load %arg3[%c0_1, %c0_2] : memref<8x128xf32, #tpu.memory_space<vmem>>, vector<8x128xf32>
    %cst = arith.constant dense<0.000000e+00> : vector<64x128xf32>
    %2 = tpu.matmul %0, %1, %cst {dimension_numbers = #tpu.dot_dimension_numbers<[1], [0], [0], [1], [0, 0, 1, 1], [], []>} : vector<64x8xf32>, vector<8x128xf32>, vector<64x128xf32> -> vector<64x128xf32>
    %c0_3 = arith.constant 0 : index
    %c0_4 = arith.constant 0 : index
    %3 = vector.load %arg5[%c0_3, %c0_4] : memref<1x128xf32, #tpu.memory_space<vmem>>, vector<1x128xf32>
    %4 = vector.broadcast %3 : vector<1x128xf32> to vector<64x128xf32>
    %5 = arith.addf %2, %4 : vector<64x128xf32>
    %c0_5 = arith.constant 0 : index
    %c0_6 = arith.constant 0 : index
    %6 = vector.load %arg4[%c0_5, %c0_6] : memref<32x128xf32, #tpu.memory_space<vmem>>, vector<32x128xf32>
    %7 = tpu.iota {dimensions = array<i32: 1>} : vector<8x128xi32>
    %c64_i32 = arith.constant 64 : i32
    %8 = vector.broadcast %c64_i32 : i32 to vector<8x128xi32>
    %9 = arith.cmpi sge, %7, %8 : vector<8x128xi32>
    %c96_i32 = arith.constant 96 : i32
    %10 = vector.broadcast %c96_i32 : i32 to vector<8x128xi32>
    %11 = arith.cmpi slt, %7, %10 : vector<8x128xi32>
    %12 = arith.andi %9, %11 : vector<8x128xi1>
    %c0_7 = arith.constant 0 : index
    %c0_8 = arith.constant 0 : index
    %13 = vector.load %arg1[%c0_7, %c0_8] : memref<8x32xf32, #tpu.memory_space<vmem>>, vector<8x32xf32>
    %c0_9 = arith.constant 0 : index
    %c0_10 = arith.constant 0 : index
    %14 = vector.load %arg2[%c0_9, %c0_10] : memref<8x32xf32, #tpu.memory_space<vmem>>, vector<8x32xf32>
    %15 = vector.extract_strided_slice %5 {offsets = [0, 0], sizes = [8, 128], strides = [1, 1]} : vector<64x128xf32> to vector<8x128xf32>
    %cst_11 = arith.constant dense<0.000000e+00> : vector<8x128xf32>
    %16 = tpu.matmul %13, %6, %cst_11 {dimension_numbers = #tpu.dot_dimension_numbers<[1], [0], [0], [1], [0, 0, 1, 1], [], []>} : vector<8x32xf32>, vector<32x128xf32>, vector<8x128xf32> -> vector<8x128xf32>
    %17 = arith.addf %15, %16 : vector<8x128xf32>
    %cst_12 = arith.constant 5.000000e-01 : f32
    %18 = vector.broadcast %cst_12 : f32 to vector<8x128xf32>
    %19 = arith.mulf %18, %17 : vector<8x128xf32>
    %20 = math.tanh %19 : vector<8x128xf32>
    %cst_13 = arith.constant 5.000000e-01 : f32
    %21 = vector.broadcast %cst_13 : f32 to vector<8x128xf32>
    %22 = arith.mulf %21, %20 : vector<8x128xf32>
    %cst_14 = arith.constant 5.000000e-01 : f32
    %23 = vector.broadcast %cst_14 : f32 to vector<8x128xf32>
    %24 = arith.addf %22, %23 : vector<8x128xf32>
    %25 = math.tanh %17 : vector<8x128xf32>
    %26 = arith.select %12, %25, %24 : vector<8x128xi1>, vector<8x128xf32>
    %27 = vector.extract_strided_slice %26 {offsets = [0, 0], sizes = [8, 32], strides = [1, 1]} : vector<8x128xf32> to vector<8x32xf32>
    %28 = vector.extract_strided_slice %26 {offsets = [0, 32], sizes = [8, 32], strides = [1, 1]} : vector<8x128xf32> to vector<8x32xf32>
    %29 = vector.extract_strided_slice %26 {offsets = [0, 64], sizes = [8, 32], strides = [1, 1]} : vector<8x128xf32> to vector<8x32xf32>
    %30 = vector.extract_strided_slice %26 {offsets = [0, 96], sizes = [8, 32], strides = [1, 1]} : vector<8x128xf32> to vector<8x32xf32>
    %31 = arith.mulf %28, %14 : vector<8x32xf32>
    %32 = arith.mulf %27, %29 : vector<8x32xf32>
    %33 = arith.addf %31, %32 : vector<8x32xf32>
    %34 = math.tanh %33 : vector<8x32xf32>
    %35 = arith.mulf %30, %34 : vector<8x32xf32>
    %36 = vector.extract_strided_slice %5 {offsets = [8, 0], sizes = [8, 128], strides = [1, 1]} : vector<64x128xf32> to vector<8x128xf32>
    %cst_15 = arith.constant dense<0.000000e+00> : vector<8x128xf32>
    %37 = tpu.matmul %35, %6, %cst_15 {dimension_numbers = #tpu.dot_dimension_numbers<[1], [0], [0], [1], [0, 0, 1, 1], [], []>} : vector<8x32xf32>, vector<32x128xf32>, vector<8x128xf32> -> vector<8x128xf32>
    %38 = arith.addf %36, %37 : vector<8x128xf32>
    %cst_16 = arith.constant 5.000000e-01 : f32
    %39 = vector.broadcast %cst_16 : f32 to vector<8x128xf32>
    %40 = arith.mulf %39, %38 : vector<8x128xf32>
    %41 = math.tanh %40 : vector<8x128xf32>
    %cst_17 = arith.constant 5.000000e-01 : f32
    %42 = vector.broadcast %cst_17 : f32 to vector<8x128xf32>
    %43 = arith.mulf %42, %41 : vector<8x128xf32>
    %cst_18 = arith.constant 5.000000e-01 : f32
    %44 = vector.broadcast %cst_18 : f32 to vector<8x128xf32>
    %45 = arith.addf %43, %44 : vector<8x128xf32>
    %46 = math.tanh %38 : vector<8x128xf32>
    %47 = arith.select %12, %46, %45 : vector<8x128xi1>, vector<8x128xf32>
    %48 = vector.extract_strided_slice %47 {offsets = [0, 0], sizes = [8, 32], strides = [1, 1]} : vector<8x128xf32> to vector<8x32xf32>
    %49 = vector.extract_strided_slice %47 {offsets = [0, 32], sizes = [8, 32], strides = [1, 1]} : vector<8x128xf32> to vector<8x32xf32>
    %50 = vector.extract_strided_slice %47 {offsets = [0, 64], sizes = [8, 32], strides = [1, 1]} : vector<8x128xf32> to vector<8x32xf32>
    %51 = vector.extract_strided_slice %47 {offsets = [0, 96], sizes = [8, 32], strides = [1, 1]} : vector<8x128xf32> to vector<8x32xf32>
    %52 = arith.mulf %49, %33 : vector<8x32xf32>
    %53 = arith.mulf %48, %50 : vector<8x32xf32>
    %54 = arith.addf %52, %53 : vector<8x32xf32>
    %55 = math.tanh %54 : vector<8x32xf32>
    %56 = arith.mulf %51, %55 : vector<8x32xf32>
    %57 = vector.extract_strided_slice %5 {offsets = [16, 0], sizes = [8, 128], strides = [1, 1]} : vector<64x128xf32> to vector<8x128xf32>
    %cst_19 = arith.constant dense<0.000000e+00> : vector<8x128xf32>
    %58 = tpu.matmul %56, %6, %cst_19 {dimension_numbers = #tpu.dot_dimension_numbers<[1], [0], [0], [1], [0, 0, 1, 1], [], []>} : vector<8x32xf32>, vector<32x128xf32>, vector<8x128xf32> -> vector<8x128xf32>
    %59 = arith.addf %57, %58 : vector<8x128xf32>
    %cst_20 = arith.constant 5.000000e-01 : f32
    %60 = vector.broadcast %cst_20 : f32 to vector<8x128xf32>
    %61 = arith.mulf %60, %59 : vector<8x128xf32>
    %62 = math.tanh %61 : vector<8x128xf32>
    %cst_21 = arith.constant 5.000000e-01 : f32
    %63 = vector.broadcast %cst_21 : f32 to vector<8x128xf32>
    %64 = arith.mulf %63, %62 : vector<8x128xf32>
    %cst_22 = arith.constant 5.000000e-01 : f32
    %65 = vector.broadcast %cst_22 : f32 to vector<8x128xf32>
    %66 = arith.addf %64, %65 : vector<8x128xf32>
    %67 = math.tanh %59 : vector<8x128xf32>
    %68 = arith.select %12, %67, %66 : vector<8x128xi1>, vector<8x128xf32>
    %69 = vector.extract_strided_slice %68 {offsets = [0, 0], sizes = [8, 32], strides = [1, 1]} : vector<8x128xf32> to vector<8x32xf32>
    %70 = vector.extract_strided_slice %68 {offsets = [0, 32], sizes = [8, 32], strides = [1, 1]} : vector<8x128xf32> to vector<8x32xf32>
    %71 = vector.extract_strided_slice %68 {offsets = [0, 64], sizes = [8, 32], strides = [1, 1]} : vector<8x128xf32> to vector<8x32xf32>
    %72 = vector.extract_strided_slice %68 {offsets = [0, 96], sizes = [8, 32], strides = [1, 1]} : vector<8x128xf32> to vector<8x32xf32>
    %73 = arith.mulf %70, %54 : vector<8x32xf32>
    %74 = arith.mulf %69, %71 : vector<8x32xf32>
    %75 = arith.addf %73, %74 : vector<8x32xf32>
    %76 = math.tanh %75 : vector<8x32xf32>
    %77 = arith.mulf %72, %76 : vector<8x32xf32>
    %78 = vector.extract_strided_slice %5 {offsets = [24, 0], sizes = [8, 128], strides = [1, 1]} : vector<64x128xf32> to vector<8x128xf32>
    %cst_23 = arith.constant dense<0.000000e+00> : vector<8x128xf32>
    %79 = tpu.matmul %77, %6, %cst_23 {dimension_numbers = #tpu.dot_dimension_numbers<[1], [0], [0], [1], [0, 0, 1, 1], [], []>} : vector<8x32xf32>, vector<32x128xf32>, vector<8x128xf32> -> vector<8x128xf32>
    %80 = arith.addf %78, %79 : vector<8x128xf32>
    %cst_24 = arith.constant 5.000000e-01 : f32
    %81 = vector.broadcast %cst_24 : f32 to vector<8x128xf32>
    %82 = arith.mulf %81, %80 : vector<8x128xf32>
    %83 = math.tanh %82 : vector<8x128xf32>
    %cst_25 = arith.constant 5.000000e-01 : f32
    %84 = vector.broadcast %cst_25 : f32 to vector<8x128xf32>
    %85 = arith.mulf %84, %83 : vector<8x128xf32>
    %cst_26 = arith.constant 5.000000e-01 : f32
    %86 = vector.broadcast %cst_26 : f32 to vector<8x128xf32>
    %87 = arith.addf %85, %86 : vector<8x128xf32>
    %88 = math.tanh %80 : vector<8x128xf32>
    %89 = arith.select %12, %88, %87 : vector<8x128xi1>, vector<8x128xf32>
    %90 = vector.extract_strided_slice %89 {offsets = [0, 0], sizes = [8, 32], strides = [1, 1]} : vector<8x128xf32> to vector<8x32xf32>
    %91 = vector.extract_strided_slice %89 {offsets = [0, 32], sizes = [8, 32], strides = [1, 1]} : vector<8x128xf32> to vector<8x32xf32>
    %92 = vector.extract_strided_slice %89 {offsets = [0, 64], sizes = [8, 32], strides = [1, 1]} : vector<8x128xf32> to vector<8x32xf32>
    %93 = vector.extract_strided_slice %89 {offsets = [0, 96], sizes = [8, 32], strides = [1, 1]} : vector<8x128xf32> to vector<8x32xf32>
    %94 = arith.mulf %91, %75 : vector<8x32xf32>
    %95 = arith.mulf %90, %92 : vector<8x32xf32>
    %96 = arith.addf %94, %95 : vector<8x32xf32>
    %97 = math.tanh %96 : vector<8x32xf32>
    %98 = arith.mulf %93, %97 : vector<8x32xf32>
    %99 = vector.extract_strided_slice %5 {offsets = [32, 0], sizes = [8, 128], strides = [1, 1]} : vector<64x128xf32> to vector<8x128xf32>
    %cst_27 = arith.constant dense<0.000000e+00> : vector<8x128xf32>
    %100 = tpu.matmul %98, %6, %cst_27 {dimension_numbers = #tpu.dot_dimension_numbers<[1], [0], [0], [1], [0, 0, 1, 1], [], []>} : vector<8x32xf32>, vector<32x128xf32>, vector<8x128xf32> -> vector<8x128xf32>
    %101 = arith.addf %99, %100 : vector<8x128xf32>
    %cst_28 = arith.constant 5.000000e-01 : f32
    %102 = vector.broadcast %cst_28 : f32 to vector<8x128xf32>
    %103 = arith.mulf %102, %101 : vector<8x128xf32>
    %104 = math.tanh %103 : vector<8x128xf32>
    %cst_29 = arith.constant 5.000000e-01 : f32
    %105 = vector.broadcast %cst_29 : f32 to vector<8x128xf32>
    %106 = arith.mulf %105, %104 : vector<8x128xf32>
    %cst_30 = arith.constant 5.000000e-01 : f32
    %107 = vector.broadcast %cst_30 : f32 to vector<8x128xf32>
    %108 = arith.addf %106, %107 : vector<8x128xf32>
    %109 = math.tanh %101 : vector<8x128xf32>
    %110 = arith.select %12, %109, %108 : vector<8x128xi1>, vector<8x128xf32>
    %111 = vector.extract_strided_slice %110 {offsets = [0, 0], sizes = [8, 32], strides = [1, 1]} : vector<8x128xf32> to vector<8x32xf32>
    %112 = vector.extract_strided_slice %110 {offsets = [0, 32], sizes = [8, 32], strides = [1, 1]} : vector<8x128xf32> to vector<8x32xf32>
    %113 = vector.extract_strided_slice %110 {offsets = [0, 64], sizes = [8, 32], strides = [1, 1]} : vector<8x128xf32> to vector<8x32xf32>
    %114 = vector.extract_strided_slice %110 {offsets = [0, 96], sizes = [8, 32], strides = [1, 1]} : vector<8x128xf32> to vector<8x32xf32>
    %115 = arith.mulf %112, %96 : vector<8x32xf32>
    %116 = arith.mulf %111, %113 : vector<8x32xf32>
    %117 = arith.addf %115, %116 : vector<8x32xf32>
    %118 = math.tanh %117 : vector<8x32xf32>
    %119 = arith.mulf %114, %118 : vector<8x32xf32>
    %120 = vector.extract_strided_slice %5 {offsets = [40, 0], sizes = [8, 128], strides = [1, 1]} : vector<64x128xf32> to vector<8x128xf32>
    %cst_31 = arith.constant dense<0.000000e+00> : vector<8x128xf32>
    %121 = tpu.matmul %119, %6, %cst_31 {dimension_numbers = #tpu.dot_dimension_numbers<[1], [0], [0], [1], [0, 0, 1, 1], [], []>} : vector<8x32xf32>, vector<32x128xf32>, vector<8x128xf32> -> vector<8x128xf32>
    %122 = arith.addf %120, %121 : vector<8x128xf32>
    %cst_32 = arith.constant 5.000000e-01 : f32
    %123 = vector.broadcast %cst_32 : f32 to vector<8x128xf32>
    %124 = arith.mulf %123, %122 : vector<8x128xf32>
    %125 = math.tanh %124 : vector<8x128xf32>
    %cst_33 = arith.constant 5.000000e-01 : f32
    %126 = vector.broadcast %cst_33 : f32 to vector<8x128xf32>
    %127 = arith.mulf %126, %125 : vector<8x128xf32>
    %cst_34 = arith.constant 5.000000e-01 : f32
    %128 = vector.broadcast %cst_34 : f32 to vector<8x128xf32>
    %129 = arith.addf %127, %128 : vector<8x128xf32>
    %130 = math.tanh %122 : vector<8x128xf32>
    %131 = arith.select %12, %130, %129 : vector<8x128xi1>, vector<8x128xf32>
    %132 = vector.extract_strided_slice %131 {offsets = [0, 0], sizes = [8, 32], strides = [1, 1]} : vector<8x128xf32> to vector<8x32xf32>
    %133 = vector.extract_strided_slice %131 {offsets = [0, 32], sizes = [8, 32], strides = [1, 1]} : vector<8x128xf32> to vector<8x32xf32>
    %134 = vector.extract_strided_slice %131 {offsets = [0, 64], sizes = [8, 32], strides = [1, 1]} : vector<8x128xf32> to vector<8x32xf32>
    %135 = vector.extract_strided_slice %131 {offsets = [0, 96], sizes = [8, 32], strides = [1, 1]} : vector<8x128xf32> to vector<8x32xf32>
    %136 = arith.mulf %133, %117 : vector<8x32xf32>
    %137 = arith.mulf %132, %134 : vector<8x32xf32>
    %138 = arith.addf %136, %137 : vector<8x32xf32>
    %139 = math.tanh %138 : vector<8x32xf32>
    %140 = arith.mulf %135, %139 : vector<8x32xf32>
    %141 = vector.extract_strided_slice %5 {offsets = [48, 0], sizes = [8, 128], strides = [1, 1]} : vector<64x128xf32> to vector<8x128xf32>
    %cst_35 = arith.constant dense<0.000000e+00> : vector<8x128xf32>
    %142 = tpu.matmul %140, %6, %cst_35 {dimension_numbers = #tpu.dot_dimension_numbers<[1], [0], [0], [1], [0, 0, 1, 1], [], []>} : vector<8x32xf32>, vector<32x128xf32>, vector<8x128xf32> -> vector<8x128xf32>
    %143 = arith.addf %141, %142 : vector<8x128xf32>
    %cst_36 = arith.constant 5.000000e-01 : f32
    %144 = vector.broadcast %cst_36 : f32 to vector<8x128xf32>
    %145 = arith.mulf %144, %143 : vector<8x128xf32>
    %146 = math.tanh %145 : vector<8x128xf32>
    %cst_37 = arith.constant 5.000000e-01 : f32
    %147 = vector.broadcast %cst_37 : f32 to vector<8x128xf32>
    %148 = arith.mulf %147, %146 : vector<8x128xf32>
    %cst_38 = arith.constant 5.000000e-01 : f32
    %149 = vector.broadcast %cst_38 : f32 to vector<8x128xf32>
    %150 = arith.addf %148, %149 : vector<8x128xf32>
    %151 = math.tanh %143 : vector<8x128xf32>
    %152 = arith.select %12, %151, %150 : vector<8x128xi1>, vector<8x128xf32>
    %153 = vector.extract_strided_slice %152 {offsets = [0, 0], sizes = [8, 32], strides = [1, 1]} : vector<8x128xf32> to vector<8x32xf32>
    %154 = vector.extract_strided_slice %152 {offsets = [0, 32], sizes = [8, 32], strides = [1, 1]} : vector<8x128xf32> to vector<8x32xf32>
    %155 = vector.extract_strided_slice %152 {offsets = [0, 64], sizes = [8, 32], strides = [1, 1]} : vector<8x128xf32> to vector<8x32xf32>
    %156 = vector.extract_strided_slice %152 {offsets = [0, 96], sizes = [8, 32], strides = [1, 1]} : vector<8x128xf32> to vector<8x32xf32>
    %157 = arith.mulf %154, %138 : vector<8x32xf32>
    %158 = arith.mulf %153, %155 : vector<8x32xf32>
    %159 = arith.addf %157, %158 : vector<8x32xf32>
    %160 = math.tanh %159 : vector<8x32xf32>
    %161 = arith.mulf %156, %160 : vector<8x32xf32>
    %162 = vector.extract_strided_slice %5 {offsets = [56, 0], sizes = [8, 128], strides = [1, 1]} : vector<64x128xf32> to vector<8x128xf32>
    %cst_39 = arith.constant dense<0.000000e+00> : vector<8x128xf32>
    %163 = tpu.matmul %161, %6, %cst_39 {dimension_numbers = #tpu.dot_dimension_numbers<[1], [0], [0], [1], [0, 0, 1, 1], [], []>} : vector<8x32xf32>, vector<32x128xf32>, vector<8x128xf32> -> vector<8x128xf32>
    %164 = arith.addf %162, %163 : vector<8x128xf32>
    %cst_40 = arith.constant 5.000000e-01 : f32
    %165 = vector.broadcast %cst_40 : f32 to vector<8x128xf32>
    %166 = arith.mulf %165, %164 : vector<8x128xf32>
    %167 = math.tanh %166 : vector<8x128xf32>
    %cst_41 = arith.constant 5.000000e-01 : f32
    %168 = vector.broadcast %cst_41 : f32 to vector<8x128xf32>
    %169 = arith.mulf %168, %167 : vector<8x128xf32>
    %cst_42 = arith.constant 5.000000e-01 : f32
    %170 = vector.broadcast %cst_42 : f32 to vector<8x128xf32>
    %171 = arith.addf %169, %170 : vector<8x128xf32>
    %172 = math.tanh %164 : vector<8x128xf32>
    %173 = arith.select %12, %172, %171 : vector<8x128xi1>, vector<8x128xf32>
    %174 = vector.extract_strided_slice %173 {offsets = [0, 0], sizes = [8, 32], strides = [1, 1]} : vector<8x128xf32> to vector<8x32xf32>
    %175 = vector.extract_strided_slice %173 {offsets = [0, 32], sizes = [8, 32], strides = [1, 1]} : vector<8x128xf32> to vector<8x32xf32>
    %176 = vector.extract_strided_slice %173 {offsets = [0, 64], sizes = [8, 32], strides = [1, 1]} : vector<8x128xf32> to vector<8x32xf32>
    %177 = vector.extract_strided_slice %173 {offsets = [0, 96], sizes = [8, 32], strides = [1, 1]} : vector<8x128xf32> to vector<8x32xf32>
    %178 = arith.mulf %175, %159 : vector<8x32xf32>
    %179 = arith.mulf %174, %176 : vector<8x32xf32>
    %180 = arith.addf %178, %179 : vector<8x32xf32>
    %181 = math.tanh %180 : vector<8x32xf32>
    %182 = arith.mulf %177, %181 : vector<8x32xf32>
    %c0_43 = arith.constant 0 : index
    %c0_44 = arith.constant 0 : index
    %183 = vector.load %arg9[%c0_43, %c0_44] : memref<8x32xf32, #tpu.memory_space<vmem>>, vector<8x32xf32>
    tpu.vector_store %arg9[%c0_43, %c0_44], %182 {strides = array<i32>} : memref<8x32xf32, #tpu.memory_space<vmem>>, vector<8x32xf32>,
    %c0_45 = arith.constant 0 : index
    %c0_46 = arith.constant 0 : index
    %184 = vector.load %arg10[%c0_45, %c0_46] : memref<8x32xf32, #tpu.memory_space<vmem>>, vector<8x32xf32>
    tpu.vector_store %arg10[%c0_45, %c0_46], %180 {strides = array<i32>} : memref<8x32xf32, #tpu.memory_space<vmem>>, vector<8x32xf32>,
    %185 = tpu.concatenate %35, %56, %77, %98, %119, %140, %161, %182 in 0 : vector<8x32xf32>, vector<8x32xf32>, vector<8x32xf32>, vector<8x32xf32>, vector<8x32xf32>, vector<8x32xf32>, vector<8x32xf32>, vector<8x32xf32> -> vector<64x32xf32>
    %c0_47 = arith.constant 0 : index
    %c0_48 = arith.constant 0 : index
    %186 = vector.load %arg6[%c0_47, %c0_48] : memref<32x8xf32, #tpu.memory_space<vmem>>, vector<32x8xf32>
    %cst_49 = arith.constant dense<0.000000e+00> : vector<64x8xf32>
    %187 = tpu.matmul %185, %186, %cst_49 {dimension_numbers = #tpu.dot_dimension_numbers<[1], [0], [0], [1], [0, 0, 1, 1], [], []>} : vector<64x32xf32>, vector<32x8xf32>, vector<64x8xf32> -> vector<64x8xf32>
    %c0_50 = arith.constant 0 : index
    %c0_51 = arith.constant 0 : index
    %188 = vector.load %arg7[%c0_50, %c0_51] : memref<1x8xf32, #tpu.memory_space<vmem>>, vector<1x8xf32>
    %189 = vector.broadcast %188 : vector<1x8xf32> to vector<64x8xf32>
    %190 = arith.addf %187, %189 : vector<64x8xf32>
    %cst_52 = arith.constant 0.000000e+00 : f32
    %191 = vector.broadcast %cst_52 : f32 to vector<64x8xf32>
    %192 = arith.maximumf %190, %191 : vector<64x8xf32>
    %cst_53 = arith.constant 0.000000e+00 : f32
    %193 = vector.broadcast %cst_53 : f32 to vector<64x8xf32>
    %194 = arith.subf %193, %192 : vector<64x8xf32>
    %c0_54 = arith.constant 0 : index
    %c0_55 = arith.constant 0 : index
    %195 = vector.load %arg8[%c0_54, %c0_55] : memref<64x8xf32, #tpu.memory_space<vmem>>, vector<64x8xf32>
    tpu.vector_store %arg8[%c0_54, %c0_55], %194 {strides = array<i32>} : memref<64x8xf32, #tpu.memory_space<vmem>>, vector<64x8xf32>,
    return
  }
}

</mosaic_0001>

<bundles_post_ra>
// kernel: tpu_custom_call.1
= control target key start
LH: loop header
LB: loop body
LE: loop exit
PB: predicated region body
PF: predicated region fallthrough
CT: control target
= control target key end

     0   :  { %16 = vsyncpa [#allocation3], 0  ;;  %vm50_vm0 = vcmask 64512   ;;  %v1480_v5 = vmov 0.0   ;;  %s1862_s0 = inlined_call_operand.vmem [shape: f32[64,8], index: 0, kind: input, shape index: {}]   ;;  %s1863_s1 = inlined_call_operand.vmem [shape: f32[8,32], index: 1, kind: input, shape index: {}]   ;;  %s1864_s2 = inlined_call_operand.vmem [shape: f32[8,32], index: 2, kind: input, shape index: {}]   ;;  %s1865_s3 = inlined_call_operand.vmem [shape: f32[8,128], index: 3, kind: input, shape index: {}]   ;;  %s1866_s4 = inlined_call_operand.vmem [shape: f32[32,128], index: 4, kind: input, shape index: {}]   ;;  %s1867_s5 = inlined_call_operand.vmem [shape: f32[1,128], index: 5, kind: input, shape index: {}]   ;;  %s1868_s6 = inlined_call_operand.vmem [shape: f32[32,8], index: 6, kind: input, shape index: {}]   ;;  %s1869_s7 = inlined_call_operand.vmem [shape: f32[1,8], index: 7, kind: input, shape index: {}]   ;;  %s1870_s8 = inlined_call_operand.vmem [shape: f32[64,8], index: 8, kind: output, shape index: {0}]   ;;  %s1871_s9 = inlined_call_operand.hbm [shape: f32[8,32], index: 9, kind: output, shape index: {1}]   ;;  %s1872_s10 = inlined_call_operand.hbm [shape: f32[8,32], index: 10, kind: output, shape index: {2}]  }
   0x1   :  { %v42_v0 = vld [vmem:[%s1865_s3] sm:$0xff]  ;;  %v39_v2 = vld [vmem:[%s1862_s0 + $0x28] sm:$0xff]  ;;  %v1555_v3 = vld [vmem:[%s1866_s4 + $0x18] sm:$0xff] }
   0x2   :  { %v38_v1 = vld [vmem:[%s1862_s0 + $0x20] sm:$0xff]  ;;  %1379 = vmatprep.subr.mxu1 %v42_v0  ;;  %1257 = vmatprep.subr.mxu0 %v42_v0  ;;  %v35_v6 = vld [vmem:[%s1862_s0 + $0x8] sm:$0xff]  ;;  %v40_v7 = vld [vmem:[%s1862_s0 + $0x30] sm:$0xff] }
   0x3   :  { %1265 = vmatprep.mubr.msk.f32.mxu1 %vm50_vm0, %v38_v1  ;;  %1380 = vmatpush3.msra.mxu1 %v42_v0  ;;  %v34_v4 = vld [vmem:[%s1862_s0] sm:$0xff]  ;;  %v1572_v8 = vld [vmem:[%s1866_s4 + $0x10] sm:$0xff] }
   0x4   :  { %1266 = vmatmul.mubr.msk.f32.vlgmr.msra.gmra.mxu1 %vm50_vm0, %v39_v2  ;;  %1271 = vmatprep.subr.mxu1 %v1480_v5 }
   0x5   :  { %1272 = vmatpush3.msra.mxu1 %v1555_v3  ;;  %1258 = vmatpush3.msra.mxu0 %v42_v0 }
   0x6   :  { %17 = vsyncpa [#allocation5], 0  ;;  %1259 = vmatprep.mubr.msk.f32.mxu0 %vm50_vm0, %v34_v4  ;;  %1273 = vmatprep.subr.mxu1 %v1480_v5  ;;  %v41_v9 = vld [vmem:[%s1862_s0 + $0x38] sm:$0xff]  ;;  %v1584_v10 = vld [vmem:[%s1866_s4 + $0x8] sm:$0xff]  ;;  %vm1481_vm1 = vmmov 0   ;;  %vm191_vm2 = vcmask 261120   ;;  %v184_v25 = vlaneseq }
   0x7   :  { %1260 = vmatmul.mubr.msk.f32.vlgmr.msra.gmra.mxu0 %vm50_vm0, %v35_v6  ;;  %1268 = vmatprep.mubr.msk.f32.mxu1 %vm50_vm0, %v40_v7  ;;  %v1593_v11 = vld [vmem:[%s1866_s4] sm:$0xff]  ;;  %s1483_s18 = smov 32   ;;  %v36_v59 = vld [vmem:[%s1862_s0 + $0x10] sm:$0xff]  ;;  %v37_v60 = vld [vmem:[%s1862_s0 + $0x18] sm:$0xff]  ;;  %s1485_s19 = smov [#allocation2]  }
   0x8   :  { %1274 = vmatpush3.msra.mxu1 %v1572_v8  ;;  %1293 = vmatprep.subr.mxu0 %v1480_v5  ;;  %v189_v12 = vld [vmem:[%s1863_s1] sm:$0xff]  ;;  %v185_v26 = vand.u32 127, %v184_v25  ;;  %s1146_s20 = sshll.u32 %s1485_s19, 4  ;;  %s1486_s3 = smov [#allocation4]   ;;  %s1147_s20 = int_to_ptr.vmem [resolvable:$true] %s1146_s20 }
   0x9   :  { %1269 = vmatmul.mubr.msk.f32.gmra.mxu1 %vm50_vm0, %v41_v9  ;;  %1275 = vmatprep.subr.mxu1 %v1480_v5  ;;  %v1632_v18 = vld [vmem:[%s1867_s5] ss:$0 sm:$0xff]  ;;  %s1482_s5 = smov 64   ;;  %s1156_s0 = sshll.u32 %s1486_s3, 4  ;;  %s1157_s0 = int_to_ptr.vmem [resolvable:$true] %s1156_s0 }
   0xa   :  { %1276 = vmatpush3.msra.mxu1 %v1584_v10  ;;  %1279 = vmatprep.mubr.msk.f32.mxu1 %vm1481_vm1, %v1480_v5  ;;  %vm186_vm3 = vcmp.ge.s32.totalorder %v185_v26, 64  ;;  %vm187_vm4 = vcmp.lt.s32.totalorder %v185_v26, 96  ;;  %v190_v33 = vld [vmem:[%s1864_s2] sm:$0xff]  ;;  %s1484_s2 = smov 96   ;;  %p1441_p1 = scmp.lt.s32.totalorder %s1147_s20, %s1147_s20 }
   0xb   :  { %1277 = vmatprep.subr.mxu1 %v1480_v5  ;;  %1294 = vmatpush3.msra.mxu0 %v1555_v3  ;;  %vm1637_vm5 = vmand %vm186_vm3, %vm187_vm4 }
   0xc   :  { %1278 = vmatpush3.msra.mxu1 %v1593_v11  ;;  %1295 = vmatprep.subr.mxu0 %v1480_v5 }
   0xd   :  { %1280 = vmatmul.mubr.msk.f32.vlgmr.msra.gmra.mxu1 %vm191_vm2, %v189_v12  ;;  %1282 = vmatprep.subr.mxu1 %v1480_v5 }
   0xe   :  { %1283 = vmatpush3.msra.mxu1 %v1555_v3  ;;  %1290 = vmatprep.mubr.msk.f32.mxu1 %vm1481_vm1, %v1480_v5 }
   0xf   :  { %1284 = vmatprep.subr.mxu1 %v1480_v5  ;;  %1296 = vmatpush3.msra.mxu0 %v1572_v8 }
  0x10   :  { %1285 = vmatpush3.msra.mxu1 %v1572_v8  ;;  %1297 = vmatprep.subr.mxu0 %v1480_v5 }
  0x11   :  { %1286 = vmatprep.subr.mxu1 %v1480_v5  ;;  %1298 = vmatpush3.msra.mxu0 %v1584_v10 }
  0x12   :  { %1287 = vmatpush3.msra.mxu1 %v1584_v10  ;;  %1299 = vmatprep.subr.mxu0 %v1480_v5 }
  0x13   :  { %1288 = vmatprep.subr.mxu1 %v1480_v5  ;;  %1300 = vmatpush3.msra.mxu0 %v1593_v11 }
  0x14   :  { %1289 = vmatpush3.msra.mxu1 %v1593_v11  ;;  %1315 = vmatprep.subr.mxu0 %v1480_v5 }
  0x15   :  { %1304 = vmatprep.subr.mxu1 %v1480_v5  ;;  %1262 = vmatprep.mubr.msk.f32.mxu0 %vm50_vm0, %v36_v59 }
  0x16   :  { %1263 = vmatmul.mubr.msk.f32.gmra.mxu0 %vm50_vm0, %v37_v60 }
  0x17   :  { %1301 = vmatprep.mubr.msk.f32.mxu0 %vm1481_vm1, %v1480_v5 }
  0xc4   :  { %v1623_v13 = vpop.f32.mrf.mxu1 }
  0xc6   :  { %v1625_v14 = vpop.f32.mrf.mxu1 }
  0xc7   :  { %v1261_v15 = vpop.f32.mrf.mxu0 }
  0xc8   :  { %v147_v44 = vadd.f32 %v1261_v15, %v1632_v18 }
  0xc9   :  { %v1627_v16 = vpop.f32.mrf.mxu1  ;;  %v141_v17 = vpop.f32.mrf.mxu0 }
  0xca   :  { %v142_v20 = vadd.f32 %v1632_v18, %v141_v17 }
  0xcb   :  { %v1634_v19 = vpop.f32.mrf.mxu1 }
  0xcd   :  { %v261_v21 = vpop.f32.mrf.mxu1 }
  0xce   :  { %v265_v22 = vadd.f32 %v261_v21, %v142_v20 }
  0xcf   :  { %v1281_v23 = vpop.f32.mrf.mxu1 }
  0xd0   :  { %v266_v24 = vmul.f32 0.5, %v265_v22 }
  0xd2   :  { %1388 = vtanh.f32 %v266_v24 }
  0xd3   :  { %1390 = vtanh.f32 %v265_v22 }
  0xd6   :  { %v1264_v1 = vpop.f32.mrf.mxu0 }
  0xd8   :  { %v151_v2 = vpop.f32.mrf.mxu0 }
  0xd9   :  { %v152_v4 = vadd.f32 %v1632_v18, %v151_v2 }
  0xdf   :  { %v1389_v27 = vpop.eup %1388 }
  0xe0   :  { %v268_v28 = vmul.f32 0.5, %v1389_v27  ;;  %v1391_v31 = vpop.eup %1390 }
  0xe2   :  { %v269_v30 = vadd.f32 0.5, %v268_v28 }
  0xe4   :  { %v271_v32 = vsel %vm1637_vm5, %v1391_v31, %v269_v30 }
  0xe5   :  { %278 = vrot.lane.b32.xlu0 %v271_v32, %s1482_s5 }
  0xe9   :  { %273 = vrot.lane.b32.xlu0 %v190_v33, %s1483_s18  ;;  %v157_v33 = vadd.f32 %v1264_v1, %v1632_v18 }
 0x157   :  { %v279_v34 = vpop.permute.xlu0 %278 }
 0x158   :  { %v281_v35 = vmul.f32 %v279_v34, %v271_v32 }
 0x15a   :  { %283 = vrot.lane.b32.xlu1 %v281_v35, %s1483_s18 }
 0x15b   :  { %v274_v36 = vpop.permute.xlu0 %273 }
 0x15c   :  { %v276_v37 = vmul.f32 %v274_v36, %v271_v32 }
 0x1cc   :  { %v284_v38 = vpop.permute.xlu1 %283 }
 0x1cd   :  { %v286_v39 = vadd.f32 %v284_v38, %v276_v37 }
 0x1cf   :  { %1392 = vtanh.f32 %v286_v39 }
 0x1dc   :  { %v1393_v40 = vpop.eup %1392 }
 0x1dd   :  { %289 = vrot.lane.b32.xlu1 %v1393_v40, %s1482_s5 }
 0x24f   :  { %v290_v41 = vpop.permute.xlu1 %289 }
 0x250   :  { %v292_v42 = vmul.f32 %v290_v41, %v271_v32 }
 0x252   :  { %294 = vrot.lane.b32.xlu0 %v292_v42, %s1483_s18 }
 0x2c4   :  { %v1651_v43 = vpop.permute.xlu0 %294 }
 0x2c5   :  { %1291 = vmatmul.mubr.msk.f32.vlgmr.msra.gmra.mxu1 %vm191_vm2, %v1651_v43 }
 0x2c6   :  { %1305 = vmatpush3.msra.mxu1 %v1555_v3  ;;  %1312 = vmatprep.mubr.msk.f32.mxu1 %vm1481_vm1, %v1480_v5 }
 0x2c7   :  { %1306 = vmatprep.subr.mxu1 %v1480_v5 }
 0x2c8   :  { %1307 = vmatpush3.msra.mxu1 %v1572_v8 }
 0x2c9   :  { %1308 = vmatprep.subr.mxu1 %v1480_v5 }
 0x2ca   :  { %1309 = vmatpush3.msra.mxu1 %v1584_v10 }
 0x2cb   :  { %1310 = vmatprep.subr.mxu1 %v1480_v5 }
 0x2cc   :  { %1311 = vmatpush3.msra.mxu1 %v1593_v11 }
 0x2cd   :  { %1326 = vmatprep.subr.mxu1 %v1480_v5 }
 0x385   :  { %v364_v45 = vpop.f32.mrf.mxu1 }
 0x386   :  { %v368_v46 = vadd.f32 %v364_v45, %v147_v44 }
 0x387   :  { %v1292_v47 = vpop.f32.mrf.mxu1 }
 0x388   :  { %v369_v48 = vmul.f32 0.5, %v368_v46 }
 0x38a   :  { %1394 = vtanh.f32 %v369_v48 }
 0x38b   :  { %1396 = vtanh.f32 %v368_v46 }
 0x397   :  { %v1395_v49 = vpop.eup %1394 }
 0x398   :  { %v371_v50 = vmul.f32 0.5, %v1395_v49  ;;  %v1397_v52 = vpop.eup %1396 }
 0x39a   :  { %v372_v51 = vadd.f32 0.5, %v371_v50 }
 0x39c   :  { %v374_v53 = vsel %vm1637_vm5, %v1397_v52, %v372_v51 }
 0x39d   :  { %377 = vrot.lane.b32.xlu1 %v374_v53, %s1482_s5  ;;  %v375_v56 = vmul.f32 %v374_v53, %v286_v39 }
 0x40f   :  { %v378_v54 = vpop.permute.xlu1 %377 }
 0x410   :  { %v380_v55 = vmul.f32 %v378_v54, %v374_v53 }
 0x412   :  { %382 = vrot.lane.b32.xlu0 %v380_v55, %s1483_s18 }
 0x484   :  { %v383_v57 = vpop.permute.xlu0 %382 }
 0x485   :  { %v385_v58 = vadd.f32 %v383_v57, %v375_v56 }
 0x487   :  { %1398 = vtanh.f32 %v385_v58 }
 0x494   :  { %v1399_v61 = vpop.eup %1398 }
 0x495   :  { %388 = vrot.lane.b32.xlu1 %v1399_v61, %s1482_s5 }
 0x507   :  { %v389_v62 = vpop.permute.xlu1 %388 }
 0x508   :  { %v391_v63 = vmul.f32 %v389_v62, %v374_v53  ;;  %v162_v53 = vadd.f32 %v1632_v18, %v1625_v14 }
 0x50a   :  { %393 = vrot.lane.b32.xlu0 %v391_v63, %s1483_s18 }
 0x57c   :  { %v1682_v0 = vpop.permute.xlu0 %393 }
 0x57d   :  { %1302 = vmatmul.mubr.msk.f32.vlgmr.msra.gmra.mxu0 %vm191_vm2, %v1682_v0 }
 0x57e   :  { %1316 = vmatpush3.msra.mxu0 %v1555_v3  ;;  %1323 = vmatprep.mubr.msk.f32.mxu0 %vm1481_vm1, %v1480_v5 }
 0x57f   :  { %1317 = vmatprep.subr.mxu0 %v1480_v5 }
 0x580   :  { %1318 = vmatpush3.msra.mxu0 %v1572_v8 }
 0x581   :  { %1319 = vmatprep.subr.mxu0 %v1480_v5 }
 0x582   :  { %1320 = vmatpush3.msra.mxu0 %v1584_v10 }
 0x583   :  { %1321 = vmatprep.subr.mxu0 %v1480_v5 }
 0x584   :  { %1322 = vmatpush3.msra.mxu0 %v1593_v11 }
 0x585   :  { %1337 = vmatprep.subr.mxu0 %v1480_v5 }
 0x63d   :  { %v463_v6 = vpop.f32.mrf.mxu0 }
 0x63e   :  { %v467_v7 = vadd.f32 %v463_v6, %v152_v4 }
 0x63f   :  { %v1303_v9 = vpop.f32.mrf.mxu0 }
 0x640   :  { %v468_v12 = vmul.f32 0.5, %v467_v7 }
 0x642   :  { %1400 = vtanh.f32 %v468_v12 }
 0x643   :  { %1402 = vtanh.f32 %v467_v7 }
 0x64f   :  { %v1401_v15 = vpop.eup %1400 }
 0x650   :  { %v470_v17 = vmul.f32 0.5, %v1401_v15  ;;  %v1403_v21 = vpop.eup %1402  ;;  %v167_v15 = vadd.f32 %v1623_v13, %v1632_v18 }
 0x652   :  { %v471_v20 = vadd.f32 0.5, %v470_v17 }
 0x654   :  { %v473_v22 = vsel %vm1637_vm5, %v1403_v21, %v471_v20 }
 0x655   :  { %476 = vrot.lane.b32.xlu1 %v473_v22, %s1482_s5  ;;  %v474_v25 = vmul.f32 %v473_v22, %v385_v58 }
 0x6c7   :  { %v477_v23 = vpop.permute.xlu1 %476 }
 0x6c8   :  { %v479_v24 = vmul.f32 %v477_v23, %v473_v22 }
 0x6ca   :  { %481 = vrot.lane.b32.xlu0 %v479_v24, %s1483_s18 }
 0x73c   :  { %v482_v26 = vpop.permute.xlu0 %481 }
 0x73d   :  { %v484_v27 = vadd.f32 %v482_v26, %v474_v25 }
 0x73f   :  { %1404 = vtanh.f32 %v484_v27 }
 0x74c   :  { %v1405_v28 = vpop.eup %1404 }
 0x74d   :  { %487 = vrot.lane.b32.xlu1 %v1405_v28, %s1482_s5 }
 0x7bf   :  { %v488_v30 = vpop.permute.xlu1 %487 }
 0x7c0   :  { %v490_v31 = vmul.f32 %v488_v30, %v473_v22 }
 0x7c2   :  { %492 = vrot.lane.b32.xlu0 %v490_v31, %s1483_s18 }
 0x834   :  { %v1703_v32 = vpop.permute.xlu0 %492 }
 0x835   :  { %1313 = vmatmul.mubr.msk.f32.vlgmr.msra.gmra.mxu1 %vm191_vm2, %v1703_v32 }
 0x836   :  { %1327 = vmatpush3.msra.mxu1 %v1555_v3  ;;  %1334 = vmatprep.mubr.msk.f32.mxu1 %vm1481_vm1, %v1480_v5 }
 0x837   :  { %1328 = vmatprep.subr.mxu1 %v1480_v5 }
 0x838   :  { %1329 = vmatpush3.msra.mxu1 %v1572_v8 }
 0x839   :  { %1330 = vmatprep.subr.mxu1 %v1480_v5 }
 0x83a   :  { %1331 = vmatpush3.msra.mxu1 %v1584_v10 }
 0x83b   :  { %1332 = vmatprep.subr.mxu1 %v1480_v5 }
 0x83c   :  { %1333 = vmatpush3.msra.mxu1 %v1593_v11 }
 0x83d   :  { %1348 = vmatprep.subr.mxu1 %v1480_v5 }
 0x8f5   :  { %v562_v34 = vpop.f32.mrf.mxu1 }
 0x8f6   :  { %v566_v35 = vadd.f32 %v562_v34, %v157_v33  ;;  %v998_v34 = vld [vmem:[%s1868_s6 + $0x10] sm:$0xff] }
 0x8f7   :  { %v1314_v36 = vpop.f32.mrf.mxu1 }
 0x8f8   :  { %v567_v37 = vmul.f32 0.5, %v566_v35  ;;  %v996_v36 = vld [vmem:[%s1868_s6] sm:$0xff] }
 0x8fa   :  { %1406 = vtanh.f32 %v567_v37 }
 0x8fb   :  { %1408 = vtanh.f32 %v566_v35  ;;  %v997_v35 = vld [vmem:[%s1868_s6 + $0x8] sm:$0xff] }
 0x907   :  { %v1407_v38 = vpop.eup %1406 }
 0x908   :  { %v569_v39 = vmul.f32 0.5, %v1407_v38  ;;  %v1409_v41 = vpop.eup %1408 }
 0x90a   :  { %v570_v40 = vadd.f32 0.5, %v569_v39 }
 0x90c   :  { %v572_v42 = vsel %vm1637_vm5, %v1409_v41, %v570_v40 }
 0x90d   :  { %575 = vrot.lane.b32.xlu1 %v572_v42, %s1482_s5  ;;  %v573_v46 = vmul.f32 %v572_v42, %v484_v27  ;;  %v999_v27 = vld [vmem:[%s1868_s6 + $0x18] sm:$0xff] }
 0x97f   :  { %v576_v44 = vpop.permute.xlu1 %575 }
 0x980   :  { %v578_v45 = vmul.f32 %v576_v44, %v572_v42 }
 0x982   :  { %580 = vrot.lane.b32.xlu0 %v578_v45, %s1483_s18 }
 0x9f4   :  { %v581_v47 = vpop.permute.xlu0 %580 }
 0x9f5   :  { %v583_v48 = vadd.f32 %v581_v47, %v573_v46 }
 0x9f7   :  { %1410 = vtanh.f32 %v583_v48 }
 0xa04   :  { %v1411_v49 = vpop.eup %1410 }
 0xa05   :  { %586 = vrot.lane.b32.xlu1 %v1411_v49, %s1482_s5 }
 0xa77   :  { %v587_v50 = vpop.permute.xlu1 %586 }
 0xa78   :  { %v589_v51 = vmul.f32 %v587_v50, %v572_v42 }
 0xa7a   :  { %591 = vrot.lane.b32.xlu0 %v589_v51, %s1483_s18 }
 0xaec   :  { %v1724_v52 = vpop.permute.xlu0 %591 }
 0xaed   :  { %1324 = vmatmul.mubr.msk.f32.vlgmr.msra.gmra.mxu0 %vm191_vm2, %v1724_v52 }
 0xaee   :  { %1338 = vmatpush3.msra.mxu0 %v1555_v3  ;;  %1345 = vmatprep.mubr.msk.f32.mxu0 %vm1481_vm1, %v1480_v5 }
 0xaef   :  { %1339 = vmatprep.subr.mxu0 %v1480_v5 }
 0xaf0   :  { %1340 = vmatpush3.msra.mxu0 %v1572_v8 }
 0xaf1   :  { %1341 = vmatprep.subr.mxu0 %v1480_v5 }
 0xaf2   :  { %1342 = vmatpush3.msra.mxu0 %v1584_v10 }
 0xaf3   :  { %1343 = vmatprep.subr.mxu0 %v1480_v5 }
 0xaf4   :  { %1344 = vmatpush3.msra.mxu0 %v1593_v11 }
 0xaf5   :  { %1359 = vmatprep.subr.mxu0 %v999_v27 }
 0xbad   :  { %v661_v54 = vpop.f32.mrf.mxu0 }
 0xbae   :  { %v665_v55 = vadd.f32 %v661_v54, %v162_v53 }
 0xbaf   :  { %v1325_v56 = vpop.f32.mrf.mxu0 }
 0xbb0   :  { %v666_v57 = vmul.f32 0.5, %v665_v55 }
 0xbb2   :  { %1412 = vtanh.f32 %v666_v57 }
 0xbb3   :  { %1414 = vtanh.f32 %v665_v55 }
 0xbbf   :  { %v1413_v58 = vpop.eup %1412 }
 0xbc0   :  { %v668_v59 = vmul.f32 0.5, %v1413_v58  ;;  %v1415_v61 = vpop.eup %1414 }
 0xbc2   :  { %v669_v60 = vadd.f32 0.5, %v668_v59 }
 0xbc4   :  { %v671_v62 = vsel %vm1637_vm5, %v1415_v61, %v669_v60 }
 0xbc5   :  { %674 = vrot.lane.b32.xlu1 %v671_v62, %s1482_s5  ;;  %v672_v14 = vmul.f32 %v671_v62, %v583_v48 }
 0xc37   :  { %v675_v63 = vpop.permute.xlu1 %674 }
 0xc38   :  { %v677_v1 = vmul.f32 %v675_v63, %v671_v62 }
 0xc3a   :  { %679 = vrot.lane.b32.xlu0 %v677_v1, %s1483_s18 }
 0xcac   :  { %v680_v2 = vpop.permute.xlu0 %679 }
 0xcad   :  { %v682_v4 = vadd.f32 %v680_v2, %v672_v14 }
 0xcaf   :  { %1416 = vtanh.f32 %v682_v4 }
 0xcbc   :  { %v1417_v6 = vpop.eup %1416 }
 0xcbd   :  { %685 = vrot.lane.b32.xlu1 %v1417_v6, %s1482_s5 }
 0xd2f   :  { %v686_v7 = vpop.permute.xlu1 %685 }
 0xd30   :  { %v688_v9 = vmul.f32 %v686_v7, %v671_v62 }
 0xd32   :  { %690 = vrot.lane.b32.xlu0 %v688_v9, %s1483_s18 }
 0xda4   :  { %v691_v12 = vpop.permute.xlu0 %690 }
 0xda5   :  { %1335 = vmatmul.mubr.msk.f32.vlgmr.msra.gmra.mxu1 %vm191_vm2, %v691_v12 }
 0xda6   :  { %1349 = vmatpush3.msra.mxu1 %v1555_v3  ;;  %1356 = vmatprep.mubr.msk.f32.mxu1 %vm1481_vm1, %v1480_v5 }
 0xda7   :  { %1350 = vmatprep.subr.mxu1 %v1480_v5 }
 0xda8   :  { %1351 = vmatpush3.msra.mxu1 %v1572_v8 }
 0xda9   :  { %1352 = vmatprep.subr.mxu1 %v1480_v5 }
 0xdaa   :  { %1353 = vmatpush3.msra.mxu1 %v1584_v10 }
 0xdab   :  { %1354 = vmatprep.subr.mxu1 %v1480_v5 }
 0xdac   :  { %1355 = vmatpush3.msra.mxu1 %v1593_v11 }
 0xe65   :  { %v760_v17 = vpop.f32.mrf.mxu1 }
 0xe66   :  { %v764_v3 = vadd.f32 %v760_v17, %v167_v15 }
 0xe67   :  { %v1336_v20 = vpop.f32.mrf.mxu1 }
 0xe68   :  { %v765_v21 = vmul.f32 0.5, %v764_v3 }
 0xe6a   :  { %1418 = vtanh.f32 %v765_v21 }
 0xe6b   :  { %1420 = vtanh.f32 %v764_v3 }
 0xe77   :  { %v1419_v22 = vpop.eup %1418 }
 0xe78   :  { %v767_v23 = vmul.f32 0.5, %v1419_v22  ;;  %v1421_v24 = vpop.eup %1420 }
 0xe7a   :  { %v768_v8 = vadd.f32 0.5, %v767_v23  ;;  %v177_v23 = vadd.f32 %v1627_v16, %v1632_v18 }
 0xe7c   :  { %v770_v10 = vsel %vm1637_vm5, %v1421_v24, %v768_v8 }
 0xe7d   :  { %773 = vrot.lane.b32.xlu1 %v770_v10, %s1482_s5  ;;  %v771_v13 = vmul.f32 %v770_v10, %v682_v4 }
 0xeef   :  { %v774_v5 = vpop.permute.xlu1 %773 }
 0xef0   :  { %v776_v11 = vmul.f32 %v774_v5, %v770_v10 }
 0xef2   :  { %778 = vrot.lane.b32.xlu0 %v776_v11, %s1483_s18 }
 0xf64   :  { %v779_v25 = vpop.permute.xlu0 %778 }
 0xf65   :  { %v1761_v26 = vadd.f32 %v779_v25, %v771_v13 }
 0xf67   :  { %1422 = vtanh.f32 %v1761_v26 }
 0xf74   :  { %v1423_v28 = vpop.eup %1422 }
 0xf75   :  { %784 = vrot.lane.b32.xlu1 %v1423_v28, %s1482_s5 }
 0xfe7   :  { %v785_v30 = vpop.permute.xlu1 %784 }
 0xfe8   :  { %v787_v31 = vmul.f32 %v785_v30, %v770_v10 }
 0xfea   :  { %789 = vrot.lane.b32.xlu0 %v787_v31, %s1483_s18 }
0x105c   :  { %v790_v33 = vpop.permute.xlu0 %789 }
0x105d   :  { %1346 = vmatmul.mubr.msk.f32.vlgmr.msra.gmra.mxu0 %vm191_vm2, %v790_v33 }
0x105e   :  { %1360 = vmatpush3.msra.mxu0 %v999_v27  ;;  %1367 = vmatprep.mubr.msk.f32.mxu0 %vm191_vm2, %v1651_v43  ;;  %v172_v43 = vadd.f32 %v1632_v18, %v1634_v19 }
0x105f   :  { %1361 = vmatprep.subr.mxu0 %v998_v34 }
0x1060   :  { %1362 = vmatpush3.msra.mxu0 %v998_v34 }
0x1061   :  { %1363 = vmatprep.subr.mxu0 %v997_v35 }
0x1062   :  { %1364 = vmatpush3.msra.mxu0 %v997_v35 }
0x1063   :  { %1365 = vmatprep.subr.mxu0 %v996_v36 }
0x1064   :  { %1366 = vmatpush3.msra.mxu0 %v996_v36 }
0x1065   :  { %1368 = vmatmul.mubr.msk.f32.vlgmr.msra.gmra.mxu0 %vm191_vm2, %v1682_v0  ;;  %v1794_v0 = vld [vmem:[%s1869_s7] ss:$0 sm:$0xff] }
0x1066   :  { %1370 = vmatprep.mubr.msk.f32.mxu0 %vm191_vm2, %v1703_v32 }
0x1069   :  { %1371 = vmatmul.mubr.msk.f32.gmra.mxu0 %vm191_vm2, %v1724_v52 }
0x106a   :  { %1373 = vmatprep.mubr.msk.f32.mxu0 %vm191_vm2, %v691_v12 }
0x106d   :  { %1374 = vmatmul.mubr.msk.f32.gmra.mxu0 %vm191_vm2, %v790_v33 }
0x111d   :  { %v859_v37 = vpop.f32.mrf.mxu0 }
0x111e   :  { %v863_v38 = vadd.f32 %v859_v37, %v172_v43 }
0x111f   :  { %v1347_v39 = vpop.f32.mrf.mxu0 }
0x1120   :  { %v864_v40 = vmul.f32 0.5, %v863_v38 }
0x1122   :  { %1424 = vtanh.f32 %v864_v40 }
0x1123   :  { %1426 = vtanh.f32 %v863_v38 }
0x1125   :  { %v1369_v32 = vpop.f32.mrf.mxu0 }
0x1126   :  { %v1081_v41 = vadd.f32 %v1369_v32, %v1794_v0 }
0x1127   :  { %v1075_v42 = vpop.f32.mrf.mxu0 }
0x1128   :  { %v1115_v44 = vmax.f32 %v1081_v41, 0.0  ;;  %v1076_v45 = vadd.f32 %v1794_v0, %v1075_v42 }
0x1129   :  { %v1372_v46 = vpop.f32.mrf.mxu0 }
0x112a   :  { %v1123_v19 = vsub.f32 0.0, %v1115_v44  ;;  %v1114_v47 = vmax.f32 %v1076_v45, 0.0  ;;  %v1091_v48 = vadd.f32 %v1372_v46, %v1794_v0 }
0x112b   :  { %v1085_v49 = vpop.f32.mrf.mxu0 }
0x112c   :  { %1131 = vst.msk [vmem:[%s1870_s8 + $0x8] sm:$0xff] %vm50_vm0, %v1123_v19  ;;  %v1122_v50 = vsub.f32 0.0, %v1114_v47  ;;  %v1117_v51 = vmax.f32 %v1091_v48, 0.0  ;;  %v1086_v52 = vadd.f32 %v1794_v0, %v1085_v49 }
0x112d   :  { %v1375_v53 = vpop.f32.mrf.mxu0 }
0x112e   :  { %1130 = vst.msk [vmem:[%s1870_s8] sm:$0xff] %vm50_vm0, %v1122_v50  ;;  %v1125_v54 = vsub.f32 0.0, %v1117_v51  ;;  %v1116_v55 = vmax.f32 %v1086_v52, 0.0  ;;  %v1101_v56 = vadd.f32 %v1375_v53, %v1794_v0 }
0x112f   :  { %v1425_v57 = vpop.eup %1424  ;;  %v1095_v58 = vpop.f32.mrf.mxu0 }
0x1130   :  { %v866_v59 = vmul.f32 0.5, %v1425_v57  ;;  %1133 = vst.msk [vmem:[%s1870_s8 + $0x18] sm:$0xff] %vm50_vm0, %v1125_v54  ;;  %v1124_v60 = vsub.f32 0.0, %v1116_v55  ;;  %v1119_v61 = vmax.f32 %v1101_v56, 0.0  ;;  %v1096_v62 = vadd.f32 %v1794_v0, %v1095_v58  ;;  %v1427_v2 = vpop.eup %1426 }
0x1132   :  { %v867_v63 = vadd.f32 0.5, %v866_v59  ;;  %1132 = vst.msk [vmem:[%s1870_s8 + $0x10] sm:$0xff] %vm50_vm0, %v1124_v60  ;;  %v1127_v1 = vsub.f32 0.0, %v1119_v61  ;;  %v1118_v14 = vmax.f32 %v1096_v62, 0.0 }
0x1134   :  { %1135 = vst.msk [vmem:[%s1870_s8 + $0x28] sm:$0xff] %vm50_vm0, %v1127_v1  ;;  %v1126_v4 = vsub.f32 0.0, %v1118_v14  ;;  %v869_v6 = vsel %vm1637_vm5, %v1427_v2, %v867_v63 }
0x1135   :  { %872 = vrot.lane.b32.xlu1 %v869_v6, %s1482_s5  ;;  %v870_v12 = vmul.f32 %v869_v6, %v1761_v26 }
0x1136   :  { %1134 = vst.msk [vmem:[%s1870_s8 + $0x20] sm:$0xff] %vm50_vm0, %v1126_v4 }
0x11a7   :  { %v873_v7 = vpop.permute.xlu1 %872 }
0x11a8   :  { %v875_v9 = vmul.f32 %v873_v7, %v869_v6 }
0x11aa   :  { %877 = vrot.lane.b32.xlu0 %v875_v9, %s1483_s18 }
0x121c   :  { %v878_v15 = vpop.permute.xlu0 %877 }
0x121d   :  { %v880_v17 = vadd.f32 %v878_v15, %v870_v12 }
0x121f   :  { %1428 = vtanh.f32 %v880_v17 }
0x122c   :  { %v1429_v3 = vpop.eup %1428 }
0x122d   :  { %883 = vrot.lane.b32.xlu1 %v1429_v3, %s1482_s5 }
0x129f   :  { %v884_v20 = vpop.permute.xlu1 %883 }
0x12a0   :  { %v886_v21 = vmul.f32 %v884_v20, %v869_v6 }
0x12a2   :  { %888 = vrot.lane.b32.xlu0 %v886_v21, %s1483_s18 }
0x1314   :  { %v889_v22 = vpop.permute.xlu0 %888 }
0x1315   :  { %1357 = vmatmul.mubr.msk.f32.vlgmr.msra.gmra.mxu1 %vm191_vm2, %v889_v22  ;;  %1376 = vmatprep.mubr.msk.f32.mxu0 %vm191_vm2, %v889_v22 }
0x13d5   :  { %v958_v8 = vpop.f32.mrf.mxu1 }
0x13d6   :  { %v962_v24 = vadd.f32 %v958_v8, %v177_v23 }
0x13d7   :  { %v1358_v10 = vpop.f32.mrf.mxu1 }
0x13d8   :  { %v963_v5 = vmul.f32 0.5, %v962_v24 }
0x13da   :  { %1430 = vtanh.f32 %v963_v5 }
0x13db   :  { %1432 = vtanh.f32 %v962_v24 }
0x13e7   :  { %v1431_v11 = vpop.eup %1430 }
0x13e8   :  { %v965_v13 = vmul.f32 0.5, %v1431_v11  ;;  %v1433_v26 = vpop.eup %1432 }
0x13ea   :  { %v966_v25 = vadd.f32 0.5, %v965_v13 }
0x13ec   :  { %v968_v27 = vsel %vm1637_vm5, %v1433_v26, %v966_v25 }
0x13ed   :  { %971 = vrot.lane.b32.xlu1 %v968_v27, %s1482_s5  ;;  %v969_v16 = vmul.f32 %v968_v27, %v880_v17 }
0x145f   :  { %v972_v28 = vpop.permute.xlu1 %971 }
0x1460   :  { %v974_v30 = vmul.f32 %v972_v28, %v968_v27 }
0x1462   :  { %976 = vrot.lane.b32.xlu0 %v974_v30, %s1483_s18 }
0x14d4   :  { %v977_v18 = vpop.permute.xlu0 %976 }
0x14d5   :  { %v979_v31 = vadd.f32 %v977_v18, %v969_v16 }
0x14d7   :  { %1434 = vtanh.f32 %v979_v31 }
0x14e4   :  { %v1435_v33 = vpop.eup %1434 }
0x14e5   :  { %982 = vrot.lane.b32.xlu1 %v1435_v33, %s1482_s5  ;;  %s1436_s5 = scalar_lea.vmem %s1147_s20, 128 }
0x14e6   :  { %p1437_p0 = scmp.ne.s32.totalorder %s1147_s20, %s1436_s5  ;;  %p1442_p2 = scmp.lt.s32.totalorder %s1436_s5, %s1436_s5 }
0x14e8   :  { %p1443_p3 = por %p1442_p2, %p1441_p1 }
0x14e9   :  { %992 = vrot.lane.b32.xlu1 %v979_v31, %s1484_s2 }
0x14ea   :  { %p1444_p4 = pnand %p1443_p3, %p1437_p0 }
0x1557   :  { %v983_v34 = vpop.permute.xlu1 %982 }
0x1558   :  { %v985_v35 = vmul.f32 %v983_v34, %v968_v27 }
0x155a   :  { %987 = vrot.lane.b32.xlu0 %v985_v35, %s1483_s18 }
0x155b   :  { %v993_v29 = vpop.permute.xlu1 %992 }
0x155c   :  { %995 = vst.msk [vmem:[#allocation4] sm:$0xff] %vm191_vm2, %v993_v29 }
0x15cc   :  { %v988_v36 = vpop.permute.xlu0 %987 }
0x15cd   :  { %990 = vst.msk [vmem:[#allocation2] sm:$0xff] %vm191_vm2, %v988_v36  ;;  %1377 = vmatmul.mubr.msk.f32.gmra.mxu0 %vm191_vm2, %v988_v36 }
0x15ce   :  { %1447 = shalt.err (!%p1444_p4)
}
0x15cf   :  { %1149 = dma.vmem_to_hbm [thread:$0]  %s1147_s20, 128, %s1871_s9, [#allocation3]  }
0x15d0   :  { %s1456_s22 = scalar_lea.vmem %s1157_s0, 128  ;;  %p1461_p6 = scmp.lt.s32.totalorder %s1157_s0, %s1157_s0 }
0x15d1   :  { %p1457_p5 = scmp.ne.s32.totalorder %s1157_s0, %s1456_s22  ;;  %p1462_p7 = scmp.lt.s32.totalorder %s1456_s22, %s1456_s22 }
0x15d3   :  { %p1463_p8 = por %p1462_p7, %p1461_p6 }
0x15d5   :  { %p1464_p9 = pnand %p1463_p8, %p1457_p5 }
0x15d7   :  { %1467 = shalt.err (!%p1464_p9)
}
0x15d8   :  { %1159 = dma.vmem_to_hbm [thread:$0]  %s1157_s0, 128, %s1872_s10, [#allocation5]  }
0x168d   :  { %v1378_v43 = vpop.f32.mrf.mxu0 }
0x168e   :  { %v1111_v37 = vadd.f32 %v1378_v43, %v1794_v0 }
0x168f   :  { %v1105_v38 = vpop.f32.mrf.mxu0 }
0x1690   :  { %v1121_v39 = vmax.f32 %v1111_v37, 0.0  ;;  %v1106_v40 = vadd.f32 %v1794_v0, %v1105_v38 }
0x1692   :  { %v1129_v32 = vsub.f32 0.0, %v1121_v39  ;;  %v1120_v41 = vmax.f32 %v1106_v40, 0.0 }
0x1694   :  { %1137 = vst.msk [vmem:[%s1870_s8 + $0x38] sm:$0xff] %vm50_vm0, %v1129_v32  ;;  %v1128_v42 = vsub.f32 0.0, %v1120_v41 }
0x1696   :  { %1136 = vst.msk [vmem:[%s1870_s8 + $0x30] sm:$0xff] %vm50_vm0, %v1128_v42 }
0x1697   :  { %1476 = dma.done.wait [#allocation3], 128  }
0x1698   :  { %1477 = vsyncadd [#allocation3], 4294967168 }
0x1699   :  { %1478 = dma.done.wait [#allocation5], 128  }
0x169a   :  { %1479 = vsyncadd [#allocation5], 4294967168 }
0x169b   :  { %1168 = vsyncpa [#allocation3], 1 }
0x169c   :  { %1169 = vsyncpa [#allocation5], 1 }

</bundles_post_ra>
